<compile_context>
chip_gen: v6e
topology: v6e:2x2x1
jax: 0.10.0
libtpu: 0.0.40
codegen_flags: <defaults>
</compile_context>

<pallas_src>
import numpy as np
import jax
import jax.numpy as jnp
from jax.experimental import pallas as pl
from jax.experimental.pallas import tpu as pltpu

EPS_LN = 1e-5
K = 3
STRIDE = 2
PAD = 1
OUT_PAD = 1
LANES = 128
VMEM_LIMIT = 48 * 1024 * 1024      # v7x: 64 MiB physical -> leave headroom; OK on v5e/v6e
VMEM_BUDGET = 36 * 1024 * 1024     # gate for the fused single-pass path


def _round_up(x, m):
    return (x + m - 1) // m * m


# ------------------------------ fused Pallas kernel ------------------------------

def _make_fused_kernel(tile_rows, n_real, np_lanes, n_elems):
    """Fused transposed-conv + per-sample LayerNorm + ReLU kernel body.

    Grid = (B, n_row_tiles).  The output block (1, R, NP) is resident in VMEM across
    the row-tile axis; each step writes its matmul result into a sub-slice, the last
    step computes the per-sample stats from the resident block and normalizes in place.
    """
    inv_n = 1.0 / float(n_elems)
    inv_nm1 = 1.0 / float(max(n_elems - 1, 1))

    def kernel(p_ref, w_ref, b_ref, g_ref, be_ref, o_ref):
        t = pl.program_id(1)

        # --- transposed conv: one phase/group-packed matmul (bf16 in, f32 acc) ---
        acc = jnp.dot(p_ref[0], w_ref[...], preferred_element_type=jnp.float32)
        acc = acc + b_ref[...]
        row0 = pl.multiple_of(t * tile_rows, tile_rows)
        o_ref[0, pl.ds(row0, tile_rows), :] = acc

        # --- finalize on the last row-tile: LayerNorm + ReLU from resident block ---
        @pl.when(t == pl.num_programs(1) - 1)
        def _():
            x = o_ref[0]                                   # (R, NP) f32, in VMEM
            mean = jnp.sum(x) * inv_n                      # pad lanes are exactly 0
            d = x - mean
            if np_lanes > n_real:                          # mask pad lanes (trace-time branch)
                lane = jax.lax.broadcasted_iota(jnp.int32, (1, np_lanes), 1)
                d = d * (lane < n_real).astype(jnp.float32)
            var = jnp.sum(d * d) * inv_nm1                 # unbiased, centered -> stable
            inv_std = 1.0 / (jnp.sqrt(var) + EPS_LN)       # torch LN: (x-mean)/(std+eps)
            scale = g_ref[...] * inv_std                   # (1, NP); pad lanes 0
            shift = be_ref[...] - mean * scale             # (1, NP); pad lanes 0
            o_ref[0] = jnp.maximum(x * scale + shift, 0.0)

    return kernel


# ------------------------------- host-side helpers -------------------------------

def _pick_group(W, Cout):
    """How many adjacent output column-groups to pack into the 128-lane N dim."""
    g0 = max(1, min(W, LANES // (4 * Cout)))
    for g in range(g0, 0, -1):
        if W % g == 0:
            return g
    return 1


def _build_weight(w_t, G, np_lanes):
    """Block-structured fused weight (2*(G+1)*Cin, np_lanes).

    Output lane ((ph*G + g)*2 + pw)*Cout + co  at packed row (m, nb) equals the
    transposed-conv output at (2m+ph, 2*(nb*G+g)+pw, co).  Patch element index is
    (dh*(G+1) + j)*Cin + ci  holding x[m+dh, nb*G+j, ci]; the weight is nonzero only
    where j == g + dw and the kernel taps kh=ph-2dh+1, kw=pw-2dw+1 are in range.
    """
    Cin, Cout = int(w_t.shape[0]), int(w_t.shape[1])
    KC = 2 * (G + 1) * Cin
    w_big = jnp.zeros((KC, np_lanes), jnp.float32)
    for ph in range(2):
        for g in range(G):
            for pw in range(2):
                lane0 = ((ph * G + g) * 2 + pw) * Cout
                for dh in (0, 1):
                    kh = ph - 2 * dh + 1
                    if not (0 <= kh < K):
                        continue
                    for dw in (0, 1):
                        kw = pw - 2 * dw + 1
                        if not (0 <= kw < K):
                            continue
                        j = g + dw
                        row0 = (dh * (G + 1) + j) * Cin
                        w_big = w_big.at[row0:row0 + Cin, lane0:lane0 + Cout].set(
                            w_t[:, :, kh, kw])
    return w_big


def _build_patches(x_nchw, G):
    """Packed input patches (B, H*(W/G), 2*(G+1)*Cin), bf16, with bottom/right halo."""
    B, Cin, H, W = x_nchw.shape
    Wg = W // G
    x = jnp.transpose(x_nchw, (0, 2, 3, 1))                    # NHWC
    xp = jnp.pad(x, ((0, 0), (0, 1), (0, 1), (0, 0)))          # zero halo
    taps = []
    for dh in (0, 1):
        for j in range(G + 1):
            taps.append(xp[:, dh:dh + H, j:j + (Wg - 1) * G + 1:G, :])  # (B,H,Wg,Cin)
    p = jnp.concatenate(taps, axis=-1)                          # (B,H,Wg,2*(G+1)*Cin)
    return p.reshape(B, H * Wg, 2 * (G + 1) * Cin).astype(jnp.bfloat16)


def _pick_block_rows(R, KC, target_bytes=2 << 20, max_rows=4096):
    """Flat tiling of the packed row dim: largest 8-aligned divisor under the budget."""
    if R % 8 != 0:
        return R                                   # single full-extent tile
    cands = [d for d in range(8, R + 1, 8) if R % d == 0]
    fit = [d for d in cands if d <= max_rows and d * KC * 2 <= target_bytes]
    return max(fit) if fit else min(cands)


# ------------------------------------ wrapper ------------------------------------

def upsample_forward(x_nchw, w_t, bias, gamma, beta, *,
                     block_rows=None, channels_last=True):
    """ConvTranspose2d(k=3,s=2,p=1,op=1,bias) + custom LayerNorm + ReLU.

    x_nchw: (B, Cin, H, W); w_t: PyTorch transposed-conv weight (Cin, Cout, K, K).
    Returns NHWC (B, 2H, 2W, Cout) by default (same values as the PyTorch module;
    pass channels_last=False for the NCHW memory layout).
    """
    B, Cin, H, W = map(int, x_nchw.shape)
    Cout = int(w_t.shape[1])
    Hout, Wout = STRIDE * H, STRIDE * W

    G = _pick_group(W, Cout)
    Wg = W // G
    R = H * Wg                                   # packed spatial rows per sample
    KC = 2 * (G + 1) * Cin                       # contraction dim (no structural zeros stored)
    n_real = 4 * G * Cout                        # real lanes: (ph, g, pw, co)
    NP = _round_up(n_real, LANES)

    patches = _build_patches(x_nchw, G)
    w_big = _build_weight(w_t, G, NP).astype(jnp.bfloat16)

    def _lanes(v):                               # broadcast per-channel param over (ph,g,pw)
        v = jnp.tile(v.astype(jnp.float32), 4 * G)
        return jnp.pad(v, (0, NP - n_real)).reshape(1, NP)

    bias_big, gamma_big, beta_big = _lanes(bias), _lanes(gamma), _lanes(beta)

    if block_rows is None:
        block_rows = _pick_block_rows(R, KC)
    assert R % block_rows == 0 and (block_rows % 8 == 0 or block_rows == R), \
        "block_rows must divide the packed row count and be 8-aligned"
    n_tiles = R // block_rows

    # Fused-path VMEM gate: resident out block (+ finalize temporaries) + pipelined
    # patch tiles + weight.
    est = 3 * R * NP * 4 + 2 * block_rows * KC * 2 + 2 * KC * NP * 2 + 6 * NP * 4
    if est > VMEM_BUDGET:
        # TODO(synk): two-pass fallback (conv+stats pass, then norm+act pass) for
        # samples whose conv output does not fit in VMEM.
        raise NotImplementedError("sample too large for the fused single-pass path")

    kernel = _make_fused_kernel(block_rows, n_real, NP, Cout * Hout * Wout)

    out = pl.pallas_call(
        kernel,
        out_shape=jax.ShapeDtypeStruct((B, R, NP), jnp.float32),
        grid=(B, n_tiles),
        in_specs=[
            pl.BlockSpec((1, block_rows, KC), lambda b, t: (b, t, 0)),
            pl.BlockSpec((KC, NP), lambda b, t: (0, 0)),
            pl.BlockSpec((1, NP), lambda b, t: (0, 0)),
            pl.BlockSpec((1, NP), lambda b, t: (0, 0)),
            pl.BlockSpec((1, NP), lambda b, t: (0, 0)),
        ],
        # same block index across the row-tile axis -> whole-sample block stays
        # resident in VMEM (accumulator pattern), written back to HBM once per sample.
        out_specs=pl.BlockSpec((1, R, NP), lambda b, t: (b, 0, 0)),
        compiler_params=pltpu.CompilerParams(
            dimension_semantics=("parallel", "arbitrary"),
            vmem_limit_bytes=VMEM_LIMIT),
    )(patches, w_big, bias_big, gamma_big, beta_big)

    # Depth-to-space: (b, m, nb, ph, g, pw, co) -> NHWC.  Single output-sized XLA
    # transpose; for Cout <= 32 there are no pad lanes so the slice below is a no-op.
    y = out[:, :, :n_real].reshape(B, H, Wg, 2, G, 2, Cout)
    y = jnp.transpose(y, (0, 1, 3, 2, 4, 5, 6)).reshape(B, Hout, Wout, Cout)
    if channels_last:
        return y
    return jnp.transpose(y, (0, 3, 1, 2))


# ------------------------------------ reference ------------------------------------

def reference_forward(x_nchw, w_t, bias, gamma, beta):
    """Pure-JAX reference (XLA dilated conv with bf16 operands + LayerNorm + ReLU), NCHW."""
    rhs = jnp.transpose(w_t[:, :, ::-1, ::-1], (1, 0, 2, 3)).astype(jnp.bfloat16)
    conv = jax.lax.conv_general_dilated(
        x_nchw.astype(jnp.bfloat16), rhs, window_strides=(1, 1),
        padding=((K - 1 - PAD, K - 1 - PAD + OUT_PAD),) * 2,
        lhs_dilation=(STRIDE, STRIDE),
        dimension_numbers=("NCHW", "OIHW", "NCHW"),
        preferred_element_type=jnp.float32)
    conv = conv + bias.reshape(1, -1, 1, 1)
    B = conv.shape[0]
    flat = conv.reshape(B, -1)
    mean = flat.mean(axis=1)
    var = jnp.sum((flat - mean[:, None]) ** 2, axis=1) / (flat.shape[1] - 1)
    std = jnp.sqrt(var)
    y = (conv - mean.reshape(B, 1, 1, 1)) / (std.reshape(B, 1, 1, 1) + EPS_LN)
    y = y * gamma.reshape(1, -1, 1, 1) + beta.reshape(1, -1, 1, 1)
    return jnp.maximum(y, 0.0)


if __name__ == "__main__":
    key = jax.random.PRNGKey(0)
    k1, k2, k3, k4 = jax.random.split(key, 4)

    B, Cin, Cout, H, W = 2, 4, 8, 16, 16
    x = jax.random.normal(k1, (B, Cin, H, W), jnp.float32)
    # deterministic synthetic params (shapes from nn.ConvTranspose2d / LayerNorm)
    w_t = jax.random.normal(k2, (Cin, Cout, K, K), jnp.float32) * 0.1
    bias = jax.random.normal(k3, (Cout,), jnp.float32) * 0.1
    gamma = jax.random.uniform(k4, (Cout,), jnp.float32)     # mimics .uniform_()
    beta = jnp.zeros((Cout,), jnp.float32)

    # block_rows=32 of the packed R=H*W/G=64 rows -> 2 row-tiles per sample:
    # exercises the resident-accumulator + finalize-on-last-tile path (grid=(2,2)).
    out = jax.block_until_ready(
        upsample_forward(x, w_t, bias, gamma, beta, block_rows=32))

    ref_nhwc = jnp.transpose(reference_forward(x, w_t, bias, gamma, beta), (0, 2, 3, 1))
    np.testing.assert_allclose(np.asarray(out), np.asarray(ref_nhwc),
                               rtol=2e-3, atol=2e-3)
    print("KERNEL_OK")
</pallas_src>

<mosaic_0001>
module attributes {stable_mosaic.version = 11 : i64} {
  func.func @kernel(%arg0: i32, %arg1: i32, %arg2: memref<1x32x40xbf16, #tpu.memory_space<vmem>>, %arg3: memref<40x128xbf16, #tpu.memory_space<vmem>>, %arg4: memref<1x128xf32, #tpu.memory_space<vmem>>, %arg5: memref<1x128xf32, #tpu.memory_space<vmem>>, %arg6: memref<1x128xf32, #tpu.memory_space<vmem>>, %arg7: memref<1x64x128xf32, #tpu.memory_space<vmem>>) attributes {dimension_semantics = [#tpu.dimension_semantics<parallel>, #tpu.dimension_semantics<arbitrary>], iteration_bounds = array<i64: 2, 2>, scalar_prefetch = 0 : i64, scratch_operands = 0 : i64, tpu.core_type = #tpu.core_type<tc>, window_params = [{transform_indices = @transform_0, window_bounds = array<i64: 1, 32, 40>}, {pipeline_mode = #tpu.pipeline_mode<synchronous>, transform_indices = @transform_1, window_bounds = array<i64: 40, 128>}, {pipeline_mode = #tpu.pipeline_mode<synchronous>, transform_indices = @transform_2, window_bounds = array<i64: 1, 128>}, {pipeline_mode = #tpu.pipeline_mode<synchronous>, transform_indices = @transform_3, window_bounds = array<i64: 1, 128>}, {pipeline_mode = #tpu.pipeline_mode<synchronous>, transform_indices = @transform_4, window_bounds = array<i64: 1, 128>}, {transform_indices = @transform_5, window_bounds = array<i64: 1, 64, 128>}]} {
    %c0 = arith.constant 0 : index
    %c0_0 = arith.constant 0 : index
    %c0_1 = arith.constant 0 : index
    %0 = vector.load %arg2[%c0, %c0_0, %c0_1] : memref<1x32x40xbf16, #tpu.memory_space<vmem>>, vector<1x32x40xbf16>
    %1 = vector.shape_cast %0 : vector<1x32x40xbf16> to vector<32x40xbf16>
    %c0_2 = arith.constant 0 : index
    %c0_3 = arith.constant 0 : index
    %2 = vector.load %arg3[%c0_2, %c0_3] : memref<40x128xbf16, #tpu.memory_space<vmem>>, vector<40x128xbf16>
    %cst = arith.constant dense<0.000000e+00> : vector<32x128xf32>
    %3 = tpu.matmul %1, %2, %cst {dimension_numbers = #tpu.dot_dimension_numbers<[1], [0], [0], [1], [0, 0, 1, 1], [], []>} : vector<32x40xbf16>, vector<40x128xbf16>, vector<32x128xf32> -> vector<32x128xf32>
    %c0_4 = arith.constant 0 : index
    %c0_5 = arith.constant 0 : index
    %4 = vector.load %arg4[%c0_4, %c0_5] : memref<1x128xf32, #tpu.memory_space<vmem>>, vector<1x128xf32>
    %5 = vector.broadcast %4 : vector<1x128xf32> to vector<32x128xf32>
    %6 = arith.addf %3, %5 : vector<32x128xf32>
    %c32_i32 = arith.constant 32 : i32
    %7 = arith.muli %arg1, %c32_i32 : i32
    %8 = tpu.assume_multiple %7, 32 : i32
    %c0_6 = arith.constant 0 : index
    %9 = arith.index_cast %8 : i32 to index
    %c0_7 = arith.constant 0 : index
    %10 = vector.load %arg7[%c0_6, %9, %c0_7] : memref<1x64x128xf32, #tpu.memory_space<vmem>>, vector<1x32x128xf32>
    %11 = vector.shape_cast %10 : vector<1x32x128xf32> to vector<32x128xf32>
    %12 = vector.shape_cast %6 : vector<32x128xf32> to vector<1x32x128xf32>
    tpu.vector_store %arg7[%c0_6, %9, %c0_7], %12 {strides = array<i32>} : memref<1x64x128xf32, #tpu.memory_space<vmem>>, vector<1x32x128xf32>,
    %c1_i32 = arith.constant 1 : i32
    %13 = arith.cmpi eq, %arg1, %c1_i32 : i32
    %14 = arith.extui %13 : i1 to i32
    %c0_i32 = arith.constant 0 : i32
    %15 = arith.cmpi ne, %14, %c0_i32 : i32
    scf.if %15 {
      %c0_8 = arith.constant 0 : index
      %c0_9 = arith.constant 0 : index
      %c0_10 = arith.constant 0 : index
      %16 = vector.load %arg7[%c0_8, %c0_9, %c0_10] : memref<1x64x128xf32, #tpu.memory_space<vmem>>, vector<1x64x128xf32>
      %17 = vector.shape_cast %16 : vector<1x64x128xf32> to vector<64x128xf32>
      %18 = vector.shape_cast %17 : vector<64x128xf32> to vector<1x64x128xf32>
      %cst_11 = arith.constant dense<0.000000e+00> : vector<1xf32>
      %19 = vector.multi_reduction <add>, %18, %cst_11 [1, 2] : vector<1x64x128xf32> to vector<1xf32>
      %20 = vector.shape_cast %19 : vector<1xf32> to vector<1x1x1xf32>
      %21 = vector.extract %20[0, 0, 0] : f32 from vector<1x1x1xf32>
      %cst_12 = arith.constant 1.22070313E-4 : f32
      %22 = arith.mulf %21, %cst_12 : f32
      %23 = vector.broadcast %22 : f32 to vector<64x128xf32>
      %24 = arith.subf %17, %23 : vector<64x128xf32>
      %25 = arith.mulf %24, %24 : vector<64x128xf32>
      %26 = vector.shape_cast %25 : vector<64x128xf32> to vector<1x64x128xf32>
      %cst_13 = arith.constant dense<0.000000e+00> : vector<1xf32>
      %27 = vector.multi_reduction <add>, %26, %cst_13 [1, 2] : vector<1x64x128xf32> to vector<1xf32>
      %28 = vector.shape_cast %27 : vector<1xf32> to vector<1x1x1xf32>
      %29 = vector.extract %28[0, 0, 0] : f32 from vector<1x1x1xf32>
      %cst_14 = arith.constant 1.22085214E-4 : f32
      %30 = arith.mulf %29, %cst_14 : f32
      %31 = math.sqrt %30 : f32
      %cst_15 = arith.constant 9.99999974E-6 : f32
      %32 = arith.addf %31, %cst_15 : f32
      %cst_16 = arith.constant 1.000000e+00 : f32
      %33 = arith.divf %cst_16, %32 : f32
      %c0_17 = arith.constant 0 : index
      %c0_18 = arith.constant 0 : index
      %34 = vector.load %arg5[%c0_17, %c0_18] : memref<1x128xf32, #tpu.memory_space<vmem>>, vector<1x128xf32>
      %35 = vector.broadcast %33 : f32 to vector<1x128xf32>
      %36 = arith.mulf %34, %35 : vector<1x128xf32>
      %c0_19 = arith.constant 0 : index
      %c0_20 = arith.constant 0 : index
      %37 = vector.load %arg6[%c0_19, %c0_20] : memref<1x128xf32, #tpu.memory_space<vmem>>, vector<1x128xf32>
      %38 = vector.broadcast %22 : f32 to vector<1x128xf32>
      %39 = arith.mulf %38, %36 : vector<1x128xf32>
      %40 = arith.subf %37, %39 : vector<1x128xf32>
      %41 = vector.broadcast %36 : vector<1x128xf32> to vector<64x128xf32>
      %42 = arith.mulf %17, %41 : vector<64x128xf32>
      %43 = vector.broadcast %40 : vector<1x128xf32> to vector<64x128xf32>
      %44 = arith.addf %42, %43 : vector<64x128xf32>
      %cst_21 = arith.constant 0.000000e+00 : f32
      %45 = vector.broadcast %cst_21 : f32 to vector<64x128xf32>
      %46 = arith.maximumf %44, %45 : vector<64x128xf32>
      %c0_22 = arith.constant 0 : index
      %c0_23 = arith.constant 0 : index
      %c0_24 = arith.constant 0 : index
      %47 = vector.load %arg7[%c0_22, %c0_23, %c0_24] : memref<1x64x128xf32, #tpu.memory_space<vmem>>, vector<1x64x128xf32>
      %48 = vector.shape_cast %47 : vector<1x64x128xf32> to vector<64x128xf32>
      %49 = vector.shape_cast %46 : vector<64x128xf32> to vector<1x64x128xf32>
      tpu.vector_store %arg7[%c0_22, %c0_23, %c0_24], %49 {strides = array<i32>} : memref<1x64x128xf32, #tpu.memory_space<vmem>>, vector<1x64x128xf32>,
    } else {
    }
    return
  }
  func.func @transform_0(%arg0: i32, %arg1: i32) -> (i32, i32, i32) {
    %c0_i32 = arith.constant 0 : i32
    %c0_i32_0 = arith.constant 0 : i32
    return %arg0, %arg1, %c0_i32 : i32, i32, i32
  }
  func.func @transform_1(%arg0: i32, %arg1: i32) -> (i32, i32) {
    %c0_i32 = arith.constant 0 : i32
    %c0_i32_0 = arith.constant 0 : i32
    %c0_i32_1 = arith.constant 0 : i32
    return %c0_i32, %c0_i32_0 : i32, i32
  }
  func.func @transform_2(%arg0: i32, %arg1: i32) -> (i32, i32) {
    %c0_i32 = arith.constant 0 : i32
    %c0_i32_0 = arith.constant 0 : i32
    %c0_i32_1 = arith.constant 0 : i32
    return %c0_i32, %c0_i32_0 : i32, i32
  }
  func.func @transform_3(%arg0: i32, %arg1: i32) -> (i32, i32) {
    %c0_i32 = arith.constant 0 : i32
    %c0_i32_0 = arith.constant 0 : i32
    %c0_i32_1 = arith.constant 0 : i32
    return %c0_i32, %c0_i32_0 : i32, i32
  }
  func.func @transform_4(%arg0: i32, %arg1: i32) -> (i32, i32) {
    %c0_i32 = arith.constant 0 : i32
    %c0_i32_0 = arith.constant 0 : i32
    %c0_i32_1 = arith.constant 0 : i32
    return %c0_i32, %c0_i32_0 : i32, i32
  }
  func.func @transform_5(%arg0: i32, %arg1: i32) -> (i32, i32, i32) {
    %c0_i32 = arith.constant 0 : i32
    %c0_i32_0 = arith.constant 0 : i32
    %c0_i32_1 = arith.constant 0 : i32
    return %arg0, %c0_i32, %c0_i32_0 : i32, i32, i32
  }
}

</mosaic_0001>

<bundles_post_ra>
// kernel: tpu_custom_call.1
= control target key start
LH: loop header
LB: loop body
LE: loop exit
PB: predicated region body
PF: predicated region fallthrough
CT: control target
= control target key end

     0   :  { %10 = vsyncpa [#allocation3], 0  ;;  %s1057_s0 = inlined_call_operand.vmem [shape: bf16[2,64,40], index: 0, kind: input, shape index: {}]   ;;  %s1058_s1 = inlined_call_operand.vmem [shape: bf16[40,128], index: 1, kind: input, shape index: {}]   ;;  %s1059_s2 = inlined_call_operand.vmem [shape: f32[1,128], index: 2, kind: input, shape index: {}]   ;;  %s1060_s3 = inlined_call_operand.vmem [shape: f32[1,128], index: 3, kind: input, shape index: {}]   ;;  %s1061_s4 = inlined_call_operand.vmem [shape: f32[1,128], index: 4, kind: input, shape index: {}]   ;;  %s1062_s5 = inlined_call_operand.hbm [shape: f32[2,64,128], index: 5, kind: output, shape index: {}]  }
   0x1   :  { %12 = vsyncpa [#allocation3 + $0x1], 0  ;;  %s838_s18 = smov 0   ;;  %s840_s19 = smov 0  }
   0x2   :  { %s842_s20 = smov 0   ;;  %s844_s21 = smov 0  }
   0x3   :  { %s846_s22 = smov 0   ;;  %s848_s23 = smov 0  }
   0x4   :  { %s850_s24 = smov 0   ;;  %s852_s25 = smov 0  }
   0x5 LB: > { %s580_s26 = sadd.s32 4294967295, %s803_s25   ;;  %s581_s27 = sadd.s32 4294967294, %s803_s25   ;;  %s803_s25 = sphi %s852_s25, %s18_s25   ;;  %s799_s24 = sphi %s850_s24, %s1071_s24   ;;  %s795_s23 = sphi %s848_s23, %s1070_s23   ;;  %s791_s22 = sphi %s846_s22, %s1069_s22   ;;  %s787_s21 = sphi %s844_s21, %s1068_s21   ;;  %s783_s20 = sphi %s842_s20, %s1067_s20   ;;  %s779_s19 = sphi %s840_s19, %s1066_s19   ;;  %s775_s18 = sphi %s838_s18, %s1065_s18  }
   0x6   : > { %s27_s28 = sadd.s32 1, %s795_s23  ;;  %s30_s29 = sadd.s32 1, %s799_s24 }
   0x7   : > { %p28_p0 = scmp.ge.s32.totalorder %s27_s28, 2  ;;  %p159_p1 = scmp.ne.s32.totalorder %s783_s20, %s779_s19 }
   0x8   : > { %p160_p2 = scmp.eq.s32.totalorder %s580_s26, 3  ;;  %p165_p4 = scmp.ne.s32.totalorder %s779_s19, %s775_s18 }
   0x9   : > { %s1073_s28 = smov (%p28_p0, %s27_s28), 0  ;;  %s1075_s29 = smov (!%p28_p0, %s30_s29), %s799_s24 }
   0xa   : > { %p887_p3 = por %p160_p2, %p159_p1  ;;  %p32_p5 = scmp.ge.s32.totalorder %s1075_s29, 2 }
   0xb   : > { %p166_p6 = scmp.eq.s32.totalorder %s581_s27, 3  ;;  %p584_p7 = scmp.ge.s32.totalorder %s803_s25, 1 }
   0xc   : > { %p209_p8 = scmp.lt.s32.totalorder %s803_s25, 5  ;;  %s1077_s29 = smov (%p32_p5, %s1075_s29), 0 }
   0xd   : > { %p897_p9 = por %p166_p6, %p165_p4  ;;  %s146_s7 = ssub.s32 %s799_s24, %s1077_s29 }
   0xe   : > { %p210_p10 = pnand %p584_p7, %p209_p8  ;;  %s149_s8 = sadd.s32 1, %s783_s20 }
   0xf   : > { %p147_p11 = scmp.eq.s32.totalorder %s146_s7, 0  ;;  %s586_s14 = sshll.u32 (!%p210_p10), %s787_s21, 2 }
  0x10   : > { %213 = sbr.rel (%p210_p10) target bundleno = 857 (0x359), region = 40  ;;  %p242_p12 = scmp.lt.s32.totalorder (!%p210_p10), %s791_s22, 1 }
  0x11   : > { %s905_s9 = scalar_select %p147_p11, %s783_s20, %s149_s8  }
  0x12   : > { %p244_p13 = scmp.lt.s32.totalorder (!%p210_p10), %s586_s14, 7  ;;  %s238_s12 = sand.u32 (!%p210_p10), 1, %s779_s19  }
  0x13   : > { %s585_s13 = sshll.u32 (!%p210_p10), %s238_s12, 6  ;;  %s597_s15 = sshll.u32 (!%p210_p10), %s787_s21, 5 }
  0x14   : > { %p598_p0 = scmp.ne.s32.totalorder (!%p210_p10), %s787_s21, 1 }
  0x15   : > { %v702_v0 = vld [vmem:[%s1058_s1 + $0x10] ss:$0 sps:$4 sm:$0xff]   ;;  %vm300_vm0 = vcmask 1043456   ;;  %v703_v1 = vld [vmem:[%s1058_s1 + $0x8] sm:$0xff]   ;;  %v704_v3 = vld [vmem:[%s1058_s1] sm:$0xff]   ;;  %s243_s17 = scalar_select %p242_p12, %s791_s22, 1 }
  0x16   : > { %620 = vmatprep.subr.msk.bf16.mxu0 %vm300_vm0, %v702_v0  ;;  %v302_v2 = vsel %vm300_vm0, %v702_v0, 0  ;;  %s1079_s14 = smov (!%p244_p13, %s586_s14), 7  ;;  %vm293_vm1 = vcmask 326656   ;;  %v589_v6 = vld [vmem:[%s1059_s2] ss:$0 sm:$0xff] }
  0x17   : > { %611 = vmatpush3.bf16.msra.mxu0 %v302_v2  ;;  %s587_s26 = sshll.u32 %s243_s17, 3 }
  0x18   : > { %612 = vmatprep.subr.bf16.mxu0 %v703_v1  ;;  %s247_s27 = sadd.s32 %s587_s26, %s1079_s14  ;;  %s929_s14 = scalar_lea.vmem [#allocation2], %s585_s13 }
  0x19   : > { %s588_s7 = sshll.u32 %s247_s27, 2  ;;  %s354_s26 = scalar_lea.vmem %s929_s14, %s597_s15 [#allocation2] }
  0x1a   : > { %s249_s11 = scalar_lea.vmem %s1057_s0, %s588_s7 }
  0x1b   : > { %613 = vmatpush3.bf16.msra.mxu0 %v703_v1  ;;  %v705_v4 = vld [vmem:[%s249_s11] sm:$0xff]   ;;  %v706_v5 = vld [vmem:[%s249_s11 + $0x8] sm:$0xff]  }
  0x1c   : > { %614 = vmatprep.subr.bf16.mxu0 %v704_v3  ;;  %616 = vmatprep.mubr.msk.bf16.mxu0 %vm293_vm1, %v705_v4 }
  0x1f   : > { %615 = vmatpush3.bf16.msra.mxu0 %v704_v3 }
  0x22   : > { %617 = vmatmul.mubr.msk.bf16.vlgmr.msra.gmra.mxu0 %vm293_vm1, %v706_v5 }
  0xe2   : > { %v618_v7 = vpop.f32.mrf.mxu0 }
  0xe3   : > { %v347_v8 = vadd.f32 %v618_v7, %v589_v6 }
  0xe4   : > { %v338_v9 = vpop.f32.mrf.mxu0 }
  0xe5   : > { %357 = vst [vmem:[%s354_s26 + $0x10] sm:$0xff] %v347_v8  ;;  %v339_v10 = vadd.f32 %v589_v6, %v338_v9 }
  0xe6   : > { %v619_v11 = vpop.f32.mrf.mxu0 }
  0xe7   : > { %355 = vst [vmem:[%s354_s26] sm:$0xff] %v339_v10  ;;  %v350_v12 = vadd.f32 %v619_v11, %v589_v6  ;;  %362 = sbr.rel (%p598_p0) target bundleno = 833 (0x341), region = 44 }
  0xe8   : > { %v341_v13 = vpop.f32.mrf.mxu0 }
  0xe9   : > { %358 = vst [vmem:[%s354_s26 + $0x18] sm:$0xff] %v350_v12  ;;  %v342_v14 = vadd.f32 %v589_v6, %v341_v13 }
  0xeb   : > { %356 = vst [vmem:[%s354_s26 + $0x8] sm:$0xff] %v342_v14 }
  0xec   : > { %v442_v12 = vlaneseq  ;;  %v435_v14 = vld [vmem:[%s1060_s3] sm:$0x1] }
  0xee   : > { %v443_v13 = vshrl.u32 %v442_v12, 7 }
  0xf2   : > { %v934_v15 = vld [vmem:[%s929_s14] sm:$0xff]  ;;  %v937_v16 = vld [vmem:[%s929_s14 + $0x8] sm:$0xff]  ;;  %v940_v17 = vld [vmem:[%s929_s14 + $0x10] sm:$0xff] }
  0xf3   : > { %v371_v18 = vadd.f32 %v937_v16, %v934_v15  ;;  %v945_v19 = vld [vmem:[%s929_s14 + $0x18] sm:$0xff]  ;;  %v949_v21 = vld [vmem:[%s929_s14 + $0x20] sm:$0xff]  ;;  %v953_v23 = vld [vmem:[%s929_s14 + $0x28] sm:$0xff] }
  0xf4   : > { %v957_v25 = vld [vmem:[%s929_s14 + $0x30] sm:$0xff]  ;;  %v961_v27 = vld [vmem:[%s929_s14 + $0x38] sm:$0xff] }
  0xf5   : > { %v372_v20 = vadd.f32 %v371_v18, %v940_v17  ;;  %v444_v18 = vsub.s32 0, %v443_v13 }
  0xf7   : > { %v373_v22 = vadd.f32 %v372_v20, %v945_v19 }
  0xf9   : > { %v374_v24 = vadd.f32 %v373_v22, %v949_v21 }
  0xfb   : > { %v375_v26 = vadd.f32 %v374_v24, %v953_v23  ;;  %v438_v24 = vld [vmem:[%s1061_s4] sm:$0x1] }
  0xfd   : > { %v376_v28 = vadd.f32 %v375_v26, %v957_v25 }
  0xff   : > { %v377_v29 = vadd.f32 %v376_v28, %v961_v27 }
 0x101   : > { %378 = vadd.xlane.f32.xlu0 %v377_v29 }
 0x18a   : > { %v379_v30 = vpop.xlane.xlu0 %378 }
 0x18b   : > { %v380_v31 = vrot.slane %v379_v30, 4 }
 0x18d   : > { %v381_v32 = vadd.f32 %v380_v31, %v379_v30 }
 0x18f   : > { %v382_v33 = vrot.slane %v381_v32, 2 }
 0x191   : > { %v383_v34 = vadd.f32 %v382_v33, %v381_v32 }
 0x193   : > { %v384_v35 = vrot.slane %v383_v34, 1 }
 0x195   : > { %v385_v36 = vadd.f32 %v384_v35, %v383_v34 }
 0x197   : > { %621 = vpush %v385_v36 }
 0x1c8   : > { %s622_s21 = spop %621 }
 0x1c9   : > { %s387_s27 = smul.f32 0.00012207031, %s622_s21 }
 0x1cb   : > { %v388_v37 = vstv %s387_s27 }
 0x1cc   : > { %v389_v38 = vsub.f32 %v934_v15, %v388_v37  ;;  %v390_v39 = vsub.f32 %v937_v16, %v388_v37  ;;  %v391_v40 = vsub.f32 %v940_v17, %v388_v37  ;;  %v392_v41 = vsub.f32 %v945_v19, %v388_v37 }
 0x1cd   : > { %v393_v44 = vsub.f32 %v949_v21, %v388_v37  ;;  %v394_v47 = vsub.f32 %v953_v23, %v388_v37  ;;  %v395_v50 = vsub.f32 %v957_v25, %v388_v37  ;;  %v396_v53 = vsub.f32 %v961_v27, %v388_v37 }
 0x1ce   : > { %v397_v42 = vmul.f32 %v389_v38, %v389_v38  ;;  %v398_v43 = vmul.f32 %v390_v39, %v390_v39  ;;  %v399_v45 = vmul.f32 %v391_v40, %v391_v40  ;;  %v400_v48 = vmul.f32 %v392_v41, %v392_v41 }
 0x1cf   : > { %v401_v51 = vmul.f32 %v393_v44, %v393_v44  ;;  %v402_v54 = vmul.f32 %v394_v47, %v394_v47  ;;  %v403_v56 = vmul.f32 %v395_v50, %v395_v50  ;;  %v404_v58 = vmul.f32 %v396_v53, %v396_v53 }
 0x1d0   : > { %v405_v46 = vadd.f32 %v398_v43, %v397_v42 }
 0x1d2   : > { %v406_v49 = vadd.f32 %v405_v46, %v399_v45 }
 0x1d4   : > { %v407_v52 = vadd.f32 %v406_v49, %v400_v48 }
 0x1d6   : > { %v408_v55 = vadd.f32 %v407_v52, %v401_v51 }
 0x1d8   : > { %v409_v57 = vadd.f32 %v408_v55, %v402_v54 }
 0x1da   : > { %v410_v59 = vadd.f32 %v409_v57, %v403_v56 }
 0x1dc   : > { %v411_v60 = vadd.f32 %v410_v59, %v404_v58 }
 0x1de   : > { %412 = vadd.xlane.f32.xlu0 %v411_v60 }
 0x267   : > { %v413_v61 = vpop.xlane.xlu0 %412 }
 0x268   : > { %v414_v62 = vrot.slane %v413_v61, 4 }
 0x26a   : > { %v415_v63 = vadd.f32 %v414_v62, %v413_v61 }
 0x26c   : > { %v416_v0 = vrot.slane %v415_v63, 2 }
 0x26e   : > { %v417_v1 = vadd.f32 %v416_v0, %v415_v63 }
 0x270   : > { %v418_v2 = vrot.slane %v417_v1, 1 }
 0x272   : > { %v419_v3 = vadd.f32 %v418_v2, %v417_v1 }
 0x274   : > { %623 = vpush %v419_v3 }
 0x2a5   : > { %s624_s7 = spop %623 }
 0x2a6   : > { %s421_s8 = smul.f32 0.00012208521, %s624_s7 }
 0x2a8   : > { %v422_v4 = vstv %s421_s8 }
 0x2a9   : > { %707 = vrsqrt.f32 %v422_v4  ;;  %vm425_vm2 = vcmp.eq.f32.partialorder %v422_v4, inf  ;;  %v428_v7 = vand.u32 2147483648, %v422_v4  ;;  %vm427_vm3 = vcmp.eq.f32.partialorder %v422_v4, 0.0 }
 0x2b6   : > { %v708_v5 = vpop.eup %707 }
 0x2b7   : > { %v424_v6 = vmul.f32 %v708_v5, %v422_v4 }
 0x2b9   : > { %v426_v8 = vsel %vm425_vm2, %v422_v4, %v424_v6 }
 0x2ba   : > { %v429_v9 = vsel %vm427_vm3, %v428_v7, %v426_v8 }
 0x2bb   : > { %625 = vpush %v429_v9 }
 0x2ec   : > { %s626_s10 = spop %625 }
 0x2ed   : > { %s431_s11 = sadd.f32 1e-05, %s626_s10 }
 0x2ef   : > { %v432_v10 = vstv %s431_s11 }
 0x2f0   : > { %709 = vrcp.f32 %v432_v10 }
 0x2fd   : > { %v710_v11 = vpop.eup %709 }
 0x2fe   : > { %627 = vpush %v710_v11 }
 0x32f   : > { %s628_s16 = spop %627 }
 0x330   : > { %v436_v20 = vstv %s628_s16 }
 0x331   : > { %v437_v22 = vmul.f32 %v436_v20, %v435_v14 }
 0x333   : > { %v439_v26 = vmul.f32 %v437_v22, %v388_v37  ;;  %v445_v28 = vrot.slane %v437_v22, %v444_v18 }
 0x335   : > { %v440_v29 = vsub.f32 %v438_v24, %v439_v26  ;;  %v447_v30 = vmul.f32 %v445_v28, %v934_v15  ;;  %v448_v31 = vmul.f32 %v445_v28, %v937_v16  ;;  %v449_v32 = vmul.f32 %v445_v28, %v940_v17 }
 0x336   : > { %v450_v33 = vmul.f32 %v445_v28, %v945_v19  ;;  %v451_v35 = vmul.f32 %v445_v28, %v949_v21  ;;  %v452_v36 = vmul.f32 %v445_v28, %v953_v23  ;;  %v453_v38 = vmul.f32 %v445_v28, %v957_v25 }
 0x337   : > { %v459_v34 = vrot.slane %v440_v29, %v444_v18  ;;  %v454_v39 = vmul.f32 %v445_v28, %v961_v27 }
 0x339   : > { %v461_v37 = vadd.f32 %v459_v34, %v447_v30  ;;  %v462_v40 = vadd.f32 %v459_v34, %v448_v31  ;;  %v463_v15 = vadd.f32 %v459_v34, %v449_v32  ;;  %v464_v16 = vadd.f32 %v459_v34, %v450_v33 }
 0x33a   : > { %v465_v17 = vadd.f32 %v459_v34, %v451_v35  ;;  %v466_v19 = vadd.f32 %v459_v34, %v452_v36  ;;  %v467_v41 = vadd.f32 %v459_v34, %v453_v38  ;;  %v468_v21 = vadd.f32 %v459_v34, %v454_v39 }
 0x33b   : > { %v469_v23 = vmax.f32 %v461_v37, 0.0  ;;  %v470_v25 = vmax.f32 %v462_v40, 0.0  ;;  %v471_v42 = vmax.f32 %v463_v15, 0.0  ;;  %v472_v27 = vmax.f32 %v464_v16, 0.0 }
 0x33c   : > { %v473_v43 = vmax.f32 %v465_v17, 0.0  ;;  %v474_v44 = vmax.f32 %v466_v19, 0.0  ;;  %v475_v45 = vmax.f32 %v467_v41, 0.0  ;;  %v476_v46 = vmax.f32 %v468_v21, 0.0 }
 0x33d   : > { %477 = vst [vmem:[%s929_s14] sm:$0xff] %v469_v23  ;;  %478 = vst [vmem:[%s929_s14 + $0x8] sm:$0xff] %v470_v25 }
 0x33e   : > { %479 = vst [vmem:[%s929_s14 + $0x10] sm:$0xff] %v471_v42  ;;  %480 = vst [vmem:[%s929_s14 + $0x18] sm:$0xff] %v472_v27 }
 0x33f   : > { %481 = vst [vmem:[%s929_s14 + $0x20] sm:$0xff] %v473_v43  ;;  %482 = vst [vmem:[%s929_s14 + $0x28] sm:$0xff] %v474_v44 }
 0x340   : > { %483 = vst [vmem:[%s929_s14 + $0x30] sm:$0xff] %v475_v45  ;;  %484 = vst [vmem:[%s929_s14 + $0x38] sm:$0xff] %v476_v46 }
 0x341 PF: > { %s604_s21 = sshll.u32 %s791_s22, 10  ;;  %s499_s10 = sshll.u32 %s929_s14, 4  ;;  %s1002_s10 = int_to_ptr.vmem [resolvable:$true] %s499_s10 }
 0x342   : > { %s999_s8 = scalar_lea.hbm %s1062_s5, %s604_s21  ;;  %s1006_s11 = scalar_lea.sflag [#allocation3], %s238_s12 }
 0x343   : > { %s711_s13 = scalar_lea.vmem %s1002_s10, 1024  ;;  %s805_s22 = smov [#allocation2]  }
 0x344   : > { %p712_p1 = scmp.ne.s32.totalorder %s1002_s10, %s711_s13  ;;  %s715_s15 = sshll.u32 %s805_s22, 4  ;;  %s716_s15 = int_to_ptr.vmem [resolvable:$false] %s715_s15 }
 0x345   : > { %s717_s16 = scalar_lea.vmem %s716_s15, 2048  ;;  %p718_p5 = scmp.lt.s32.totalorder %s1002_s10, %s716_s15 }
 0x346   : > { %p713_p2 = pnand %p712_p1, %p887_p3  ;;  %p719_p6 = scmp.lt.s32.totalorder %s717_s16, %s711_s13 }
 0x348   : > { %p714_p4 = pneg %p713_p2  ;;  %p720_p7 = por %p719_p6, %p718_p5 }
 0x34a   : > { %p721_p8 = pnand %p720_p7, %p714_p4 }
 0x34c   : > { %724 = shalt.err (!%p721_p8)
}
 0x34d   : > { %s725_s12 = scalar_lea.hbm %s999_s8, 1024  ;;  %s729_s26 = scalar_lea.hbm %s1062_s5, 2048 }
 0x34e   : > { %p726_p10 = scmp.ne.s32.totalorder %s999_s8, %s725_s12  ;;  %p730_p13 = scmp.lt.s32.totalorder %s999_s8, %s1062_s5 }
 0x34f   : > { %p731_p0 = scmp.lt.s32.totalorder %s729_s26, %s725_s12 }
 0x350   : > { %p727_p11 = pnand %p726_p10, %p887_p3 }
 0x351   : > { %p732_p1 = por %p731_p0, %p730_p13 }
 0x352   : > { %p728_p12 = pneg %p727_p11 }
 0x354   : > { %p733_p2 = pnand %p732_p1, %p728_p12 }
 0x356   : > { %736 = shalt.err (!%p733_p2)
}
 0x357   : > { %s806_s7 = smov 128   ;;  %s807_s13 = smov 8  }
 0x358   : > { %629 = dma.vmem_to_hbm [thread:$0]  (%p887_p3), %s1002_s10, 1024, %s999_s8, %s1006_s11, %s806_s7, %s806_s7, %s807_s13  }
 0x359 PF: > { %p635_p4 = scmp.ge.s32.totalorder %s803_s25, 2  ;;  %s514_s22 = sand.u32 1, %s775_s18  }
 0x35a   : > { %s515_s15 = scalar_lea.sflag [#allocation3], %s514_s22 }
 0x35b   : > { %p632_p5 = pnand %p635_p4, %p897_p9 }
 0x35d   : > { %p633_p6 = pneg %p632_p5 }
 0x35f   : > { %770 = dma.done.wait (%p633_p6), %s515_s15, 1024  }
 0x360   : > { %772 = vsyncadd (%p633_p6), %s515_s15, 4294966272  ;;  %s18_s25 = sadd.s32 1, %s803_s25   ;;  %s1065_s18 = smov %s779_s19 }
 0x361   : > { %p15_p7 = scmp.ge.s32.totalorder %s18_s25, 6   ;;  %s1066_s19 = smov %s783_s20 }
 0x362   : > { %s1067_s20 = smov %s905_s9  ;;  %s1068_s21 = smov %s795_s23 }
 0x363   : > { %s1069_s22 = smov %s799_s24  ;;  %s1070_s23 = smov %s1073_s28 }
 0x364   : > { %s1071_s24 = smov %s1077_s29  ;;  %17 = sbr.rel (!%p15_p7) target bundleno = 5 (0x5), region = 80 }
 0x369   :  { %520 = vsyncpa [#allocation3], 1 }
 0x36a   :  { %522 = vsyncpa [#allocation3 + $0x1], 1 }

</bundles_post_ra>
